<compile_context>
chip_gen: v5e
topology: v5e:2x2
jax: 0.10.0
libtpu: 0.0.40
codegen_flags: <defaults>
</compile_context>

<pallas_src>
import functools

import jax
import jax.numpy as jnp
from jax.experimental import pallas as pl
from jax.experimental.pallas import tpu as pltpu


STATE_DIM = 11                      # Hopper-v3 observation_space.shape[0]
ACTION_DIM = 3                      # Hopper-v3 action_space.shape[0]
IN_DIM = STATE_DIM + ACTION_DIM     # 14
H1, H2, OUT = 64, 32, 1

_LANE = 128
_BTILE_CAP = 2048


# ----------------------------------------------------------------------------
# Kernels (feature-major: features on sublanes, batch on lanes)
# ----------------------------------------------------------------------------
def _critic_kernel(q_ref, w1_ref, b1_ref, w2_ref, b2_ref, w3_ref, b3_ref,
                   o_ref):
    q = q_ref[...]                                              # [14, Bt]
    h1 = jnp.dot(w1_ref[...], q,
                 preferred_element_type=jnp.float32) + b1_ref[...]   # [64, Bt]
    h1 = jnp.maximum(h1, 0.0)
    h1 = h1.astype(q.dtype)          # no-op in fp32; keeps MXU in bf16 mode
    h2 = jnp.dot(w2_ref[...], h1,
                 preferred_element_type=jnp.float32) + b2_ref[...]   # [32, Bt]
    h2 = jnp.maximum(h2, 0.0)
    # OUT=1: VPU multiply + sublane reduce instead of an N=1 MXU pass.
    o = jnp.sum(w3_ref[...] * h2, axis=0, keepdims=True) + b3_ref[...]  # [1, Bt]
    o_ref[...] = o.astype(o_ref.dtype)


def _twin_critic_kernel(q_ref,
                        w1a_ref, b1a_ref, w2a_ref, b2a_ref, w3a_ref, b3a_ref,
                        w1b_ref, b1b_ref, w2b_ref, b2b_ref, w3b_ref, b3b_ref,
                        o_ref):
    q = q_ref[...]                                              # [14, Bt]

    def head(w1, b1, w2, b2, w3, b3):
        h1 = jnp.dot(w1[...], q,
                     preferred_element_type=jnp.float32) + b1[...]
        h1 = jnp.maximum(h1, 0.0).astype(q.dtype)
        h2 = jnp.dot(w2[...], h1,
                     preferred_element_type=jnp.float32) + b2[...]
        h2 = jnp.maximum(h2, 0.0)
        return jnp.sum(w3[...] * h2, axis=0, keepdims=True) + b3[...]

    q1 = head(w1a_ref, b1a_ref, w2a_ref, b2a_ref, w3a_ref, b3a_ref)  # [1, Bt]
    q2 = head(w1b_ref, b1b_ref, w2b_ref, b2b_ref, w3b_ref, b3b_ref)  # [1, Bt]
    o_ref[...] = jnp.concatenate([q1, q2], axis=0).astype(o_ref.dtype)


# ----------------------------------------------------------------------------
# Parameters (PyTorch nn.Linear-style init, stored feature-major)
# ----------------------------------------------------------------------------
def init_critic_params(key, state_dim=STATE_DIM, action_dim=ACTION_DIM):
    params = {}

    def linear(key, fan_in, fan_out):
        kw, kb = jax.random.split(key)
        bound = 1.0 / jnp.sqrt(float(fan_in))
        w = jax.random.uniform(kw, (fan_out, fan_in), jnp.float32, -bound, bound)
        b = jax.random.uniform(kb, (fan_out, 1), jnp.float32, -bound, bound)
        return w, b

    key, k1, k2, k3 = jax.random.split(key, 4)
    params["w1"], params["b1"] = linear(k1, state_dim + action_dim, H1)  # [64,14],[64,1]
    params["w2"], params["b2"] = linear(k2, H1, H2)                      # [32,64],[32,1]
    w3, b3 = linear(k3, H2, OUT)                                         # [1,32],[1,1]
    params["w3_col"] = w3.T                                              # [32,1] for VPU path
    params["b3"] = b3                                                    # [1,1]
    return params


# ----------------------------------------------------------------------------
# Tile selection & pallas_call plumbing
# ----------------------------------------------------------------------------
def _choose_btile(batch):
    """Lane tile: big enough to amortize per-step overhead, but >=2 tiles for
    B > 128 so v7x's second TensorCore gets work; capped at 2048 (working set
    stays a few MiB on every generation)."""
    padded = pl.cdiv(batch, _LANE) * _LANE
    if padded <= _LANE:
        return _LANE
    half = pl.cdiv(padded // 2, _LANE) * _LANE
    return int(max(_LANE, min(_BTILE_CAP, half)))


def _weight_specs():
    const = lambda i: (0, 0)
    return [
        pl.BlockSpec((H1, IN_DIM), const),   # w1  (VMEM-resident across grid)
        pl.BlockSpec((H1, 1), const),        # b1
        pl.BlockSpec((H2, H1), const),       # w2
        pl.BlockSpec((H2, 1), const),        # b2
        pl.BlockSpec((H2, 1), const),        # w3_col
        pl.BlockSpec((1, 1), const),         # b3
    ]


def _weight_args(params, compute_dtype):
    return (params["w1"].astype(compute_dtype), params["b1"],
            params["w2"].astype(compute_dtype), params["b2"],
            params["w3_col"], params["b3"])


def _critic_pallas(qT, params, btile, compute_dtype):
    """qT: [IN_DIM, Bp] feature-major with Bp a multiple of btile."""
    Bp = qT.shape[1]
    grid = (Bp // btile,)
    return pl.pallas_call(
        _critic_kernel,
        out_shape=jax.ShapeDtypeStruct((OUT, Bp), jnp.float32),
        grid=grid,
        in_specs=[pl.BlockSpec((IN_DIM, btile), lambda i: (0, i))]
                 + _weight_specs(),
        out_specs=pl.BlockSpec((OUT, btile), lambda i: (0, i)),
        compiler_params=pltpu.CompilerParams(
            dimension_semantics=("parallel",)),
    )(qT.astype(compute_dtype), *_weight_args(params, compute_dtype))


# ----------------------------------------------------------------------------
# Public entry points
# ----------------------------------------------------------------------------
@functools.partial(jax.jit, static_argnames=("compute_dtype",))
def critic_forward(state, action, params, compute_dtype=jnp.float32):
    """PyTorch-compatible signature: state [B, 11], action [B, 3] -> [B, 1]."""
    B = state.shape[0]
    btile = _choose_btile(B)
    Bp = pl.cdiv(B, btile) * btile
    # One fused pack: concat-of-transposes (features on sublanes) + one pad.
    qT = jnp.concatenate(
        [state.T.astype(jnp.float32), action.T.astype(jnp.float32)], axis=0)
    qT = jnp.pad(qT, ((0, 0), (0, Bp - B)))
    out_t = _critic_pallas(qT, params, btile, compute_dtype)
    return out_t[:, :B].T                                      # [B, 1]


@functools.partial(jax.jit, static_argnames=("compute_dtype",))
def critic_forward_packed(qT, params, compute_dtype=jnp.float32):
    """Fast path for producers that keep activations feature-major.
    qT: [IN_DIM, B] (state rows then action rows, batch on lanes) -> [1, B]."""
    B = qT.shape[1]
    btile = _choose_btile(B)
    Bp = pl.cdiv(B, btile) * btile
    qTp = jnp.pad(qT.astype(jnp.float32), ((0, 0), (0, Bp - B)))
    return _critic_pallas(qTp, params, btile, compute_dtype)[:, :B]


@functools.partial(jax.jit, static_argnames=("compute_dtype",))
def twin_critic_forward(state, action, params_q1, params_q2,
                        compute_dtype=jnp.float32):
    """Fused TD3 twin critics: one pallas_call, shared state/action tiles.
    Returns (q1 [B,1], q2 [B,1])."""
    B = state.shape[0]
    btile = _choose_btile(B)
    Bp = pl.cdiv(B, btile) * btile
    qT = jnp.concatenate(
        [state.T.astype(jnp.float32), action.T.astype(jnp.float32)], axis=0)
    qT = jnp.pad(qT, ((0, 0), (0, Bp - B)))
    grid = (Bp // btile,)
    out_t = pl.pallas_call(
        _twin_critic_kernel,
        out_shape=jax.ShapeDtypeStruct((2, Bp), jnp.float32),
        grid=grid,
        in_specs=[pl.BlockSpec((IN_DIM, btile), lambda i: (0, i))]
                 + _weight_specs() + _weight_specs(),
        out_specs=pl.BlockSpec((2, btile), lambda i: (0, i)),
        compiler_params=pltpu.CompilerParams(
            dimension_semantics=("parallel",)),
    )(qT.astype(compute_dtype),
      *_weight_args(params_q1, compute_dtype),
      *_weight_args(params_q2, compute_dtype))
    q = out_t[:, :B]
    return q[0:1, :].T, q[1:2, :].T


# ----------------------------------------------------------------------------
# Pure-JAX reference (identical math to the PyTorch module)
# ----------------------------------------------------------------------------
def critic_reference(state, action, params):
    q = jnp.concatenate([state, action], axis=1)               # [B, 14]
    h1 = jax.nn.relu(q @ params["w1"].T + params["b1"].T)
    h2 = jax.nn.relu(h1 @ params["w2"].T + params["b2"].T)
    return h2 @ params["w3_col"] + params["b3"]                # [B, 1]


if __name__ == "__main__":
    key = jax.random.PRNGKey(0)
    kp1, kp2, ks, ka, ks2, ka2 = jax.random.split(key, 6)

    params = init_critic_params(kp1)
    params2 = init_critic_params(kp2)

    # Small-batch path (single tile).
    B = 8
    state = jax.random.normal(ks, (B, STATE_DIM), jnp.float32)
    action = jax.random.normal(ka, (B, ACTION_DIM), jnp.float32)

    q_kernel = critic_forward(state, action, params)
    jax.block_until_ready(q_kernel)
    q_ref = critic_reference(state, action, params)
    assert q_kernel.shape == (B, 1), q_kernel.shape
    assert jnp.allclose(q_kernel, q_ref, atol=1e-5, rtol=1e-5), \
        "Pallas kernel output mismatch vs. reference (small batch)"

    # Packed feature-major entry point (producer keeps batch on lanes).
    qT = jnp.concatenate([state.T, action.T], axis=0)          # [14, B]
    q_packed = critic_forward_packed(qT, params)
    jax.block_until_ready(q_packed)
    assert jnp.allclose(q_packed.T, q_ref, atol=1e-5, rtol=1e-5), \
        "Packed-path output mismatch vs. reference"

    # Multi-tile path (exercises 2-tile grid + batch padding).
    B2 = 300
    state2 = jax.random.normal(ks2, (B2, STATE_DIM), jnp.float32)
    action2 = jax.random.normal(ka2, (B2, ACTION_DIM), jnp.float32)
    q2_kernel = critic_forward(state2, action2, params)
    jax.block_until_ready(q2_kernel)
    q2_ref = critic_reference(state2, action2, params)
    assert q2_kernel.shape == (B2, 1), q2_kernel.shape
    assert jnp.allclose(q2_kernel, q2_ref, atol=1e-5, rtol=1e-5), \
        "Pallas kernel output mismatch vs. reference (multi-tile batch)"

    # Fused twin-critic path (one launch, shared input tiles).
    q1_twin, q2_twin = twin_critic_forward(state, action, params, params2)
    jax.block_until_ready((q1_twin, q2_twin))
    assert jnp.allclose(q1_twin, critic_reference(state, action, params),
                        atol=1e-5, rtol=1e-5), "Twin critic Q1 mismatch"
    assert jnp.allclose(q2_twin, critic_reference(state, action, params2),
                        atol=1e-5, rtol=1e-5), "Twin critic Q2 mismatch"

    print("KERNEL_OK")
</pallas_src>

<mosaic_0001>
module attributes {stable_mosaic.version = 11 : i64} {
  func.func @_critic_kernel(%arg0: i32, %arg1: memref<14x128xf32, #tpu.memory_space<vmem>>, %arg2: memref<64x14xf32, #tpu.memory_space<vmem>>, %arg3: memref<64x1xf32, #tpu.memory_space<vmem>>, %arg4: memref<32x64xf32, #tpu.memory_space<vmem>>, %arg5: memref<32x1xf32, #tpu.memory_space<vmem>>, %arg6: memref<32x1xf32, #tpu.memory_space<vmem>>, %arg7: memref<1x1xf32, #tpu.memory_space<vmem>>, %arg8: memref<1x128xf32, #tpu.memory_space<vmem>>) attributes {dimension_semantics = [#tpu.dimension_semantics<parallel>], iteration_bounds = array<i64: 1>, scalar_prefetch = 0 : i64, scratch_operands = 0 : i64, tpu.core_type = #tpu.core_type<tc>, window_params = [{transform_indices = @transform_0, window_bounds = array<i64: 14, 128>}, {pipeline_mode = #tpu.pipeline_mode<synchronous>, transform_indices = @transform_1, window_bounds = array<i64: 64, 14>}, {pipeline_mode = #tpu.pipeline_mode<synchronous>, transform_indices = @transform_2, window_bounds = array<i64: 64, 1>}, {pipeline_mode = #tpu.pipeline_mode<synchronous>, transform_indices = @transform_3, window_bounds = array<i64: 32, 64>}, {pipeline_mode = #tpu.pipeline_mode<synchronous>, transform_indices = @transform_4, window_bounds = array<i64: 32, 1>}, {pipeline_mode = #tpu.pipeline_mode<synchronous>, transform_indices = @transform_5, window_bounds = array<i64: 32, 1>}, {pipeline_mode = #tpu.pipeline_mode<synchronous>, transform_indices = @transform_6, window_bounds = array<i64: 1, 1>}, {transform_indices = @transform_7, window_bounds = array<i64: 1, 128>}]} {
    %c0 = arith.constant 0 : index
    %c0_0 = arith.constant 0 : index
    %0 = vector.load %arg1[%c0, %c0_0] : memref<14x128xf32, #tpu.memory_space<vmem>>, vector<14x128xf32>
    %c0_1 = arith.constant 0 : index
    %c0_2 = arith.constant 0 : index
    %1 = vector.load %arg2[%c0_1, %c0_2] : memref<64x14xf32, #tpu.memory_space<vmem>>, vector<64x14xf32>
    %cst = arith.constant dense<0.000000e+00> : vector<64x128xf32>
    %2 = tpu.matmul %1, %0, %cst {dimension_numbers = #tpu.dot_dimension_numbers<[1], [0], [0], [1], [0, 0, 1, 1], [], []>} : vector<64x14xf32>, vector<14x128xf32>, vector<64x128xf32> -> vector<64x128xf32>
    %c0_3 = arith.constant 0 : index
    %c0_4 = arith.constant 0 : index
    %3 = vector.load %arg3[%c0_3, %c0_4] : memref<64x1xf32, #tpu.memory_space<vmem>>, vector<64x1xf32>
    %4 = vector.broadcast %3 : vector<64x1xf32> to vector<64x128xf32>
    %5 = arith.addf %2, %4 : vector<64x128xf32>
    %cst_5 = arith.constant 0.000000e+00 : f32
    %6 = vector.broadcast %cst_5 : f32 to vector<64x128xf32>
    %7 = arith.maximumf %5, %6 : vector<64x128xf32>
    %c0_6 = arith.constant 0 : index
    %c0_7 = arith.constant 0 : index
    %8 = vector.load %arg4[%c0_6, %c0_7] : memref<32x64xf32, #tpu.memory_space<vmem>>, vector<32x64xf32>
    %cst_8 = arith.constant dense<0.000000e+00> : vector<32x128xf32>
    %9 = tpu.matmul %8, %7, %cst_8 {dimension_numbers = #tpu.dot_dimension_numbers<[1], [0], [0], [1], [0, 0, 1, 1], [], []>} : vector<32x64xf32>, vector<64x128xf32>, vector<32x128xf32> -> vector<32x128xf32>
    %c0_9 = arith.constant 0 : index
    %c0_10 = arith.constant 0 : index
    %10 = vector.load %arg5[%c0_9, %c0_10] : memref<32x1xf32, #tpu.memory_space<vmem>>, vector<32x1xf32>
    %11 = vector.broadcast %10 : vector<32x1xf32> to vector<32x128xf32>
    %12 = arith.addf %9, %11 : vector<32x128xf32>
    %cst_11 = arith.constant 0.000000e+00 : f32
    %13 = vector.broadcast %cst_11 : f32 to vector<32x128xf32>
    %14 = arith.maximumf %12, %13 : vector<32x128xf32>
    %c0_12 = arith.constant 0 : index
    %c0_13 = arith.constant 0 : index
    %15 = vector.load %arg6[%c0_12, %c0_13] : memref<32x1xf32, #tpu.memory_space<vmem>>, vector<32x1xf32>
    %16 = vector.broadcast %15 : vector<32x1xf32> to vector<32x128xf32>
    %17 = arith.mulf %16, %14 : vector<32x128xf32>
    %cst_14 = arith.constant dense<0.000000e+00> : vector<128xf32>
    %18 = vector.multi_reduction <add>, %17, %cst_14 [0] : vector<32x128xf32> to vector<128xf32>
    %19 = vector.shape_cast %18 : vector<128xf32> to vector<1x128xf32>
    %c0_15 = arith.constant 0 : index
    %c0_16 = arith.constant 0 : index
    %20 = vector.load %arg7[%c0_15, %c0_16] : memref<1x1xf32, #tpu.memory_space<vmem>>, vector<1x1xf32>
    %21 = vector.broadcast %20 : vector<1x1xf32> to vector<1x128xf32>
    %22 = arith.addf %19, %21 : vector<1x128xf32>
    %c0_17 = arith.constant 0 : index
    %c0_18 = arith.constant 0 : index
    %23 = vector.load %arg8[%c0_17, %c0_18] : memref<1x128xf32, #tpu.memory_space<vmem>>, vector<1x128xf32>
    tpu.vector_store %arg8[%c0_17, %c0_18], %22 {strides = array<i32>} : memref<1x128xf32, #tpu.memory_space<vmem>>, vector<1x128xf32>,
    return
  }
  func.func @transform_0(%arg0: i32) -> (i32, i32) {
    %c0_i32 = arith.constant 0 : i32
    %c0_i32_0 = arith.constant 0 : i32
    return %c0_i32, %arg0 : i32, i32
  }
  func.func @transform_1(%arg0: i32) -> (i32, i32) {
    %c0_i32 = arith.constant 0 : i32
    %c0_i32_0 = arith.constant 0 : i32
    %c0_i32_1 = arith.constant 0 : i32
    return %c0_i32, %c0_i32_0 : i32, i32
  }
  func.func @transform_2(%arg0: i32) -> (i32, i32) {
    %c0_i32 = arith.constant 0 : i32
    %c0_i32_0 = arith.constant 0 : i32
    %c0_i32_1 = arith.constant 0 : i32
    return %c0_i32, %c0_i32_0 : i32, i32
  }
  func.func @transform_3(%arg0: i32) -> (i32, i32) {
    %c0_i32 = arith.constant 0 : i32
    %c0_i32_0 = arith.constant 0 : i32
    %c0_i32_1 = arith.constant 0 : i32
    return %c0_i32, %c0_i32_0 : i32, i32
  }
  func.func @transform_4(%arg0: i32) -> (i32, i32) {
    %c0_i32 = arith.constant 0 : i32
    %c0_i32_0 = arith.constant 0 : i32
    %c0_i32_1 = arith.constant 0 : i32
    return %c0_i32, %c0_i32_0 : i32, i32
  }
  func.func @transform_5(%arg0: i32) -> (i32, i32) {
    %c0_i32 = arith.constant 0 : i32
    %c0_i32_0 = arith.constant 0 : i32
    %c0_i32_1 = arith.constant 0 : i32
    return %c0_i32, %c0_i32_0 : i32, i32
  }
  func.func @transform_6(%arg0: i32) -> (i32, i32) {
    %c0_i32 = arith.constant 0 : i32
    %c0_i32_0 = arith.constant 0 : i32
    %c0_i32_1 = arith.constant 0 : i32
    return %c0_i32, %c0_i32_0 : i32, i32
  }
  func.func @transform_7(%arg0: i32) -> (i32, i32) {
    %c0_i32 = arith.constant 0 : i32
    %c0_i32_0 = arith.constant 0 : i32
    return %c0_i32, %arg0 : i32, i32
  }
}

</mosaic_0001>

<bundles_post_ra>
// kernel: critic_forward.1
= control target key start
LH: loop header
LB: loop body
LE: loop exit
PB: predicated region body
PF: predicated region fallthrough
CT: control target
= control target key end

     0   :  { %vm111_vm0 = vcmask 1045504   ;;  %v315_v0 = vmov 0   ;;  %vm86_vm1 = vcmask 113664   ;;  %vm192_vm2 = vcmask 523264   ;;  %s460_s2 = inlined_call_operand.vmem [shape: f32[64,1], index: 2, kind: input, shape index: {}]   ;;  %s461_s0 = inlined_call_operand.vmem [shape: f32[14,128], index: 0, kind: input, shape index: {}]   ;;  %s462_s1 = inlined_call_operand.vmem [shape: f32[64,14], index: 1, kind: input, shape index: {}]   ;;  %s463_s6 = inlined_call_operand.<no memory space> [shape: f32[1,1], index: 6, kind: input, shape index: {}]   ;;  %s464_s4 = inlined_call_operand.vmem [shape: f32[32,1], index: 4, kind: input, shape index: {}]   ;;  %s465_s5 = inlined_call_operand.vmem [shape: f32[32,1], index: 5, kind: input, shape index: {}]   ;;  %s466_s3 = inlined_call_operand.vmem [shape: f32[32,64], index: 3, kind: input, shape index: {}]   ;;  %s467_s7 = inlined_call_operand.vmem [shape: f32[1,128], index: 7, kind: output, shape index: {}]  }
   0x1   :  { %312 = vset.pattern.permute.xlu0 %v315_v0  ;;  %v45_v1 = vld [vmem:[%s460_s2 + $0x38] sm:$0xff]  ;;  %v29_v2 = vld [vmem:[%s461_s0 + $0x8] sm:$0x3f]  ;;  %313 = vset.pattern.permute.xlu1 %v315_v0  ;;  %v28_v4 = vld [vmem:[%s461_s0] sm:$0xff]  ;;  %v12_v7 = vstv %s463_s6 }
   0x2   :  { %v43_v3 = vld [vmem:[%s460_s2 + $0x28] sm:$0xff]  ;;  %83 = vperm.xlu0 %312, %v45_v1   ;;  %301 = vmatpush.msk.msra.mxu2 %vm111_vm0, %v29_v2  ;;  %v34_v5 = vld [vmem:[%s462_s1 + $0x20] sm:$0xff]  ;;  %13 = vst [vmem:[#allocation2] sm:$0x1] %v12_v7  ;;  %v44_v8 = vld [vmem:[%s460_s2 + $0x30] sm:$0xff] }
   0x3   :  { %73 = vperm.xlu1 %313, %v43_v3   ;;  %288 = vmatpush.msk.msra.mxu0 %vm111_vm0, %v29_v2  ;;  %v30_v6 = vld [vmem:[%s462_s1] sm:$0xff]  ;;  %v41_v9 = vld [vmem:[%s460_s2 + $0x18] sm:$0xff]  ;;  %v35_v11 = vld [vmem:[%s462_s1 + $0x28] sm:$0xff] }
   0x4   :  { %302 = vmatpush.msra.mxu2 %v28_v4  ;;  %314 = vset.pattern.permute.xlu2 %v315_v0  ;;  %v42_v10 = vld [vmem:[%s460_s2 + $0x20] sm:$0xff]  ;;  %v31_v12 = vld [vmem:[%s462_s1 + $0x8] sm:$0xff]  ;;  %v40_v13 = vld [vmem:[%s460_s2 + $0x10] sm:$0xff] }
   0x5   :  { %293 = vmatmul.msk.f32.vlgmr.msra.gmra.mxu2 %vm86_vm1, %v34_v5  ;;  %130 = vmatpush.msra.mxu0 %v28_v4  ;;  %v39_v14 = vld [vmem:[%s460_s2 + $0x8] sm:$0xff]  ;;  %v38_v15 = vld [vmem:[%s460_s2] sm:$0xff]  ;;  %v36_v16 = vld [vmem:[%s462_s1 + $0x30] sm:$0xff] }
   0x6   :  { %289 = vmatmul.msk.f32.vlgmr.msra.gmra.mxu0 %vm86_vm1, %v30_v6  ;;  %63 = vperm.xlu2 %314, %v41_v9   ;;  %v32_v17 = vld [vmem:[%s462_s1 + $0x10] sm:$0xff]  ;;  %v168_v18 = vld [vmem:[%s464_s4] sm:$0xff]  ;;  %v169_v19 = vld [vmem:[%s464_s4 + $0x8] sm:$0xff] }
   0x7   :  { %v170_v20 = vld [vmem:[%s464_s4 + $0x10] sm:$0xff]  ;;  %v37_v21 = vld [vmem:[%s462_s1 + $0x38] sm:$0xff]  ;;  %v238_v24 = vld [vmem:[%s465_s5] sm:$0xff] }
   0x8   :  { %v33_v22 = vld [vmem:[%s462_s1 + $0x18] sm:$0xff]  ;;  %v239_v25 = vld [vmem:[%s465_s5 + $0x8] sm:$0xff]  ;;  %v240_v26 = vld [vmem:[%s465_s5 + $0x10] sm:$0xff] }
   0x9   :  { %v171_v23 = vld [vmem:[%s464_s4 + $0x18] sm:$0xff]  ;;  %v275_v28 = vld [vmem:[#allocation2] sm:$0x1]  ;;  %v165_v62 = vld [vmem:[%s466_s3 + $0x8] sm:$0xff] }
   0xa   :  { %78 = vperm.xlu0 %312, %v44_v8   ;;  %v241_v27 = vld [vmem:[%s465_s5 + $0x18] sm:$0xff]  ;;  %v164_v61 = vld [vmem:[%s466_s3] sm:$0xff]  ;;  %v166_v63 = vld [vmem:[%s466_s3 + $0x10] sm:$0xff] }
   0xb   :  { %68 = vperm.xlu1 %313, %v42_v10   ;;  %v167_v0 = vld [vmem:[%s466_s3 + $0x18] sm:$0xff] }
   0xd   :  { %294 = vmatmul.msk.f32.gmra.mxu2 %vm86_vm1, %v35_v11 }
   0xe   :  { %290 = vmatmul.msk.f32.gmra.mxu0 %vm86_vm1, %v31_v12  ;;  %58 = vperm.xlu2 %314, %v40_v13  }
  0x12   :  { %53 = vperm.xlu0 %312, %v39_v14  }
  0x13   :  { %48 = vperm.xlu1 %313, %v38_v15  }
  0x15   :  { %295 = vmatmul.msk.f32.gmra.mxu2 %vm86_vm1, %v36_v16 }
  0x16   :  { %291 = vmatmul.msk.f32.gmra.mxu0 %vm86_vm1, %v32_v17  ;;  %174 = vperm.xlu2 %314, %v168_v18  }
  0x1a   :  { %179 = vperm.xlu0 %312, %v169_v19  }
  0x1b   :  { %184 = vperm.xlu1 %313, %v170_v20  }
  0x1d   :  { %296 = vmatmul.msk.f32.gmra.mxu2 %vm86_vm1, %v37_v21 }
  0x1e   :  { %292 = vmatmul.msk.f32.gmra.mxu0 %vm86_vm1, %v33_v22  ;;  %189 = vperm.xlu2 %314, %v171_v23  }
  0x22   :  { %244 = vperm.xlu0 %312, %v238_v24  }
  0x23   :  { %249 = vperm.xlu1 %313, %v239_v25  }
  0x26   :  { %254 = vperm.xlu2 %314, %v240_v26  }
  0x2a   :  { %259 = vperm.xlu0 %312, %v241_v27  }
  0x2b   :  { %278 = vperm.xlu1 %313, %v275_v28  }
  0x60   :  { %v64_v37 = vpop.permute.xlu2 %63 }
  0x68   :  { %v59_v50 = vpop.permute.xlu2 %58 }
  0x70   :  { %v175_v1 = vpop.permute.xlu2 %174 }
  0x74   :  { %v84_v33 = vpop.permute.xlu0 %83 }
  0x75   :  { %v74_v34 = vpop.permute.xlu1 %73 }
  0x78   :  { %v190_v5 = vpop.permute.xlu2 %189 }
  0x7c   :  { %v79_v38 = vpop.permute.xlu0 %78 }
  0x7d   :  { %v69_v42 = vpop.permute.xlu1 %68 }
  0x80   :  { %v255_v17 = vpop.permute.xlu2 %254 }
  0x83   :  { %v132_v29 = vpop.f32.mrf.mxu0 }
  0x84   :  { %v54_v53 = vpop.permute.xlu0 %53 }
  0x85   :  { %v49_v56 = vpop.permute.xlu1 %48 }
  0x86   :  { %v133_v57 = vadd.f32 %v132_v29, %v49_v56 }
  0x88   :  { %v144_v30 = vpop.f32.mrf.mxu2  ;;  %v156_v60 = vmax.f32 %v133_v57, 0.0 }
  0x89   :  { %v145_v46 = vadd.f32 %v144_v30, %v69_v42 }
  0x8b   :  { %v135_v32 = vpop.f32.mrf.mxu0  ;;  %v160_v51 = vmax.f32 %v145_v46, 0.0 }
  0x8c   :  { %v136_v54 = vadd.f32 %v135_v32, %v54_v53  ;;  %v180_v2 = vpop.permute.xlu0 %179 }
  0x8d   :  { %v185_v4 = vpop.permute.xlu1 %184 }
  0x8e   :  { %v157_v59 = vmax.f32 %v136_v54, 0.0 }
  0x90   :  { %v147_v31 = vpop.f32.mrf.mxu2 }
  0x91   :  { %v148_v43 = vadd.f32 %v147_v31, %v74_v34 }
  0x93   :  { %v138_v36 = vpop.f32.mrf.mxu0  ;;  %v161_v48 = vmax.f32 %v148_v43, 0.0 }
  0x94   :  { %v139_v52 = vadd.f32 %v138_v36, %v59_v50  ;;  %v245_v11 = vpop.permute.xlu0 %244 }
  0x95   :  { %v250_v15 = vpop.permute.xlu1 %249 }
  0x96   :  { %v158_v58 = vmax.f32 %v139_v52, 0.0 }
  0x98   :  { %v150_v35 = vpop.f32.mrf.mxu2 }
  0x99   :  { %v151_v40 = vadd.f32 %v150_v35, %v79_v38 }
  0x9b   :  { %v141_v45 = vpop.f32.mrf.mxu0  ;;  %v162_v47 = vmax.f32 %v151_v40, 0.0 }
  0x9c   :  { %v142_v49 = vadd.f32 %v141_v45, %v64_v37  ;;  %v260_v24 = vpop.permute.xlu0 %259 }
  0x9d   :  { %v279_v32 = vpop.permute.xlu1 %278 }
  0x9e   :  { %v159_v55 = vmax.f32 %v142_v49, 0.0  ;;  %v281_v34 = vperm.slane %v279_v32, 0 }
  0xa0   :  { %v153_v39 = vpop.f32.mrf.mxu2 }
  0xa1   :  { %v154_v41 = vadd.f32 %v153_v39, %v84_v33 }
  0xa3   :  { %v163_v44 = vmax.f32 %v154_v41, 0.0 }
  0xa5   :  { %213 = vmatpush.msra.mxu1 %v163_v44  ;;  %303 = vmatpush.msra.mxu3 %v163_v44 }
  0xa7   :  { %214 = vmatpush.msra.mxu1 %v162_v47  ;;  %304 = vmatpush.msra.mxu3 %v162_v47 }
  0xa9   :  { %215 = vmatpush.msra.mxu1 %v161_v48  ;;  %305 = vmatpush.msra.mxu3 %v161_v48 }
  0xab   :  { %216 = vmatpush.msra.mxu1 %v160_v51  ;;  %306 = vmatpush.msra.mxu3 %v160_v51 }
  0xad   :  { %217 = vmatpush.msra.mxu1 %v159_v55  ;;  %307 = vmatpush.msra.mxu3 %v159_v55 }
  0xaf   :  { %218 = vmatpush.msra.mxu1 %v158_v58  ;;  %308 = vmatpush.msra.mxu3 %v158_v58 }
  0xb1   :  { %219 = vmatpush.msra.mxu1 %v157_v59  ;;  %309 = vmatpush.msra.mxu3 %v157_v59 }
  0xb3   :  { %220 = vmatpush.msra.mxu1 %v156_v60  ;;  %310 = vmatpush.msra.mxu3 %v156_v60 }
  0xb4   :  { %297 = vmatmul.msk.f32.vlgmr.msra.gmra.mxu1 %vm192_vm2, %v164_v61  ;;  %298 = vmatmul.msk.f32.vlgmr.msra.gmra.mxu3 %vm192_vm2, %v165_v62 }
  0xbc   :  { %299 = vmatmul.msk.f32.gmra.mxu3 %vm192_vm2, %v166_v63 }
  0xc4   :  { %300 = vmatmul.msk.f32.gmra.mxu3 %vm192_vm2, %v167_v0 }
 0x131   :  { %v222_v6 = vpop.f32.mrf.mxu1 }
 0x132   :  { %v223_v9 = vadd.f32 %v222_v6, %v175_v1 }
 0x134   :  { %v234_v13 = vmax.f32 %v223_v9, 0.0 }
 0x136   :  { %v262_v19 = vmul.f32 %v245_v11, %v234_v13 }
 0x137   :  { %v225_v3 = vpop.f32.mrf.mxu3 }
 0x138   :  { %v226_v7 = vadd.f32 %v225_v3, %v180_v2 }
 0x13a   :  { %v235_v12 = vmax.f32 %v226_v7, 0.0 }
 0x13c   :  { %v263_v16 = vmul.f32 %v250_v15, %v235_v12 }
 0x13e   :  { %v266_v22 = vadd.f32 %v263_v16, %v262_v19 }
 0x13f   :  { %v228_v8 = vpop.f32.mrf.mxu3 }
 0x140   :  { %v229_v10 = vadd.f32 %v228_v8, %v185_v4 }
 0x142   :  { %v236_v14 = vmax.f32 %v229_v10, 0.0 }
 0x144   :  { %v264_v20 = vmul.f32 %v255_v17, %v236_v14 }
 0x146   :  { %v267_v25 = vadd.f32 %v266_v22, %v264_v20 }
 0x147   :  { %v231_v18 = vpop.f32.mrf.mxu3 }
 0x148   :  { %v232_v21 = vadd.f32 %v231_v18, %v190_v5 }
 0x14a   :  { %v237_v23 = vmax.f32 %v232_v21, 0.0 }
 0x14c   :  { %v265_v26 = vmul.f32 %v260_v24, %v237_v23 }
 0x14e   :  { %v268_v27 = vadd.f32 %v267_v25, %v265_v26 }
 0x150   :  { %v269_v28 = vrot.slane %v268_v27, 4 }
 0x152   :  { %v270_v29 = vadd.f32 %v269_v28, %v268_v27 }
 0x154   :  { %v271_v30 = vrot.slane %v270_v29, 2 }
 0x156   :  { %v272_v31 = vadd.f32 %v271_v30, %v270_v29 }
 0x158   :  { %v273_v33 = vrot.slane %v272_v31, 1 }
 0x15a   :  { %v274_v35 = vadd.f32 %v273_v33, %v272_v31 }
 0x15c   :  { %v282_v36 = vadd.f32 %v281_v34, %v274_v35 }
 0x15e   :  { %283 = vst [vmem:[%s467_s7] sm:$0x1] %v282_v36 }

</bundles_post_ra>
